<compile_context>
chip_gen: v6e
topology: v6e:2x2x1
jax: 0.10.0
libtpu: 0.0.40
codegen_flags: <defaults>
</compile_context>

<pallas_src>
import functools

import jax
import jax.numpy as jnp
from jax.experimental import pallas as pl
from jax.experimental.pallas import tpu as pltpu


def _round_up(n, m):
    return ((n + m - 1) // m) * m


# ---------------------------------------------------------------------------
# Kernels
# ---------------------------------------------------------------------------

def _forward_tile(x_ref, w1_ref, b1_ref, w2_ref, b2_ref):
    """relu(x @ W1 + b1) @ W2 + b2 for one batch tile. Returns (TB, Ap) f32."""
    x = x_ref[...]                                   # (TB, K)  f32
    w1 = w1_ref[...]                                 # (K, Hp)  f32, Hp = 128

    # fc1: K is tiny (4) -> unrolled VPU broadcast-FMA, skip a degenerate-K MXU matmul.
    h = x[:, 0:1] * w1[0:1, :] + b1_ref[...]         # (TB, Hp)
    for k in range(1, x.shape[1]):                   # static unroll, K-1 FMAs
        h = h + x[:, k:k + 1] * w1[k:k + 1, :]
    h = jnp.maximum(h, 0.0)

    # fc2: (TB,128) x (128,128) MXU matmul; padded hidden rows / action cols are zeros.
    return jnp.dot(h, w2_ref[...], preferred_element_type=jnp.float32) + b2_ref[...]


def dqn_q_kernel(x_ref, w1_ref, b1_ref, w2_ref, b2_ref, o_ref, *, action_dim):
    q = _forward_tile(x_ref, w1_ref, b1_ref, w2_ref, b2_ref)    # (TB, Ap)
    # Store only the real action columns: masked vst of `action_dim` lanes per row
    # instead of a 128-lane padded writeback + post-kernel slice.
    o_ref[...] = q[:, :action_dim]


def dqn_act_kernel(x_ref, w1_ref, b1_ref, w2_ref, b2_ref, o_ref, *, action_dim):
    q = _forward_tile(x_ref, w1_ref, b1_ref, w2_ref, b2_ref)    # (TB, Ap)
    ids = jax.lax.broadcasted_iota(jnp.int32, q.shape, 1)       # lane indices
    qm = jnp.where(ids < action_dim, q, -jnp.inf)               # mask padded actions
    qmax = jnp.max(qm, axis=-1, keepdims=True)
    first = jnp.min(
        jnp.where(qm >= qmax, ids.astype(jnp.float32), float(q.shape[1])),
        axis=-1, keepdims=True)                                  # first argmax index
    o_ref[...] = first.astype(jnp.int32)                         # (TB, 1) int32


# ---------------------------------------------------------------------------
# Wrappers
# ---------------------------------------------------------------------------

def pad_params(w1, b1, w2, b2):
    """Pad weights ONCE into the canonical lane-dense layout (not per forward call)."""
    K, H = w1.shape
    A = w2.shape[1]
    Hp = _round_up(H, 128)
    Ap = _round_up(A, 128)
    return dict(
        w1=jnp.zeros((K, Hp), jnp.float32).at[:, :H].set(w1),
        b1=jnp.zeros((1, Hp), jnp.float32).at[:, :H].set(b1),
        w2=jnp.zeros((Hp, Ap), jnp.float32).at[:H, :A].set(w2),
        b2=jnp.zeros((1, Ap), jnp.float32).at[:, :A].set(b2),
        action_dim=A,
    )


def _batch_tiling(B, block_b):
    Bp8 = _round_up(B, 8)
    TB = _round_up(min(block_b, Bp8), 8)          # tile must be a multiple of 8
    # Keep >=2 grid blocks when the batch allows it so ("parallel",) can shard
    # across both TensorCores on v7x (measured no-op on single-TC v5e/v6e).
    if TB >= Bp8 and Bp8 >= 16:
        TB = _round_up(Bp8 // 2, 8)
    Bp = _round_up(Bp8, TB)
    return TB, Bp


def _call(kernel, out_dtype, out_cols, x, params, block_b):
    B, K = x.shape
    w1p, b1p, w2p, b2p = params["w1"], params["b1"], params["w2"], params["b2"]
    Hp, Ap = w1p.shape[1], w2p.shape[1]
    TB, Bp = _batch_tiling(B, block_b)
    xp = x if Bp == B else jnp.zeros((Bp, K), x.dtype).at[:B].set(x)

    out = pl.pallas_call(
        functools.partial(kernel, action_dim=params["action_dim"]),
        out_shape=jax.ShapeDtypeStruct((Bp, out_cols), out_dtype),
        grid_spec=pltpu.PrefetchScalarGridSpec(
            num_scalar_prefetch=0,
            grid=(Bp // TB,),
            in_specs=[
                pl.BlockSpec((TB, K), lambda i: (i, 0)),     # x: tiled over batch
                pl.BlockSpec((K, Hp), lambda i: (0, 0)),     # W1: resident in VMEM
                pl.BlockSpec((1, Hp), lambda i: (0, 0)),     # b1: resident
                pl.BlockSpec((Hp, Ap), lambda i: (0, 0)),    # W2: resident
                pl.BlockSpec((1, Ap), lambda i: (0, 0)),     # b2: resident
            ],
            out_specs=pl.BlockSpec((TB, out_cols), lambda i: (i, 0)),
        ),
        compiler_params=pltpu.CompilerParams(
            dimension_semantics=("parallel",)),
    )(xp, w1p, b1p, w2p, b2p)
    return out if Bp == B else out[:B]


def dqn_forward(x, params, *, block_b=512):
    """Q-values: relu(x @ W1 + b1) @ W2 + b2.  x: (B, state_dim) -> (B, action_dim)."""
    return _call(dqn_q_kernel, jnp.float32, params["action_dim"], x, params, block_b)


def dqn_act(x, params, *, block_b=512):
    """Greedy action argmax_a Q(x, a), fused in-kernel.  x: (B, state_dim) -> (B,) int32."""
    return _call(dqn_act_kernel, jnp.int32, 1, x, params, block_b)[:, 0]


def init_params(key, state_dim, hidden_size, action_dim):
    # Deterministic init mimicking PyTorch Linear's U(-1/sqrt(fan_in), 1/sqrt(fan_in)).
    k1, k2, k3, k4 = jax.random.split(key, 4)
    bound1 = 1.0 / jnp.sqrt(state_dim)
    bound2 = 1.0 / jnp.sqrt(hidden_size)
    w1 = jax.random.uniform(k1, (state_dim, hidden_size), jnp.float32, -bound1, bound1)
    b1 = jax.random.uniform(k2, (hidden_size,), jnp.float32, -bound1, bound1)
    w2 = jax.random.uniform(k3, (hidden_size, action_dim), jnp.float32, -bound2, bound2)
    b2 = jax.random.uniform(k4, (action_dim,), jnp.float32, -bound2, bound2)
    return w1, b1, w2, b2


if __name__ == "__main__":
    # CartPole-v1: state_dim=4, action_dim=2, hidden=64.
    state_dim, hidden_size, action_dim = 4, 64, 2

    key = jax.random.PRNGKey(0)
    kx, kp = jax.random.split(key)
    w1, b1, w2, b2 = init_params(kp, state_dim, hidden_size, action_dim)

    # Pad weights once; padded layout is the canonical parameter layout.
    params = pad_params(w1, b1, w2, b2)

    def ref(x):
        return jnp.maximum(x @ w1 + b1, 0.0) @ w2 + b2

    # 1) Replay-buffer sized batched call (2 parallel grid blocks of 128 rows).
    xb = jax.random.normal(kx, (256, state_dim), jnp.float32)
    out_b = jax.block_until_ready(dqn_forward(xb, params))
    assert out_b.shape == (256, action_dim)
    assert jnp.allclose(out_b, ref(xb), atol=1e-5, rtol=1e-5)

    # 2) Tiny env-step call: Q-values plus in-kernel greedy argmax.
    xs = xb[:2]
    out_s = jax.block_until_ready(dqn_forward(xs, params))
    assert out_s.shape == (2, action_dim)
    assert jnp.allclose(out_s, ref(xs), atol=1e-5, rtol=1e-5)

    act_s = jax.block_until_ready(dqn_act(xs, params))
    assert act_s.shape == (2,)
    assert jnp.array_equal(act_s, jnp.argmax(ref(xs), axis=-1).astype(jnp.int32))

    # TODO(synk): for the acting loop with fixed weights, add cross-call weight
    # prefetch (P10) so the ~67 KiB resident weights are not re-DMA'd every step.

    print("KERNEL_OK")
</pallas_src>

<mosaic_0001>
module attributes {stable_mosaic.version = 11 : i64} {
  func.func @dqn_q_kernel(%arg0: i32, %arg1: memref<128x4xf32, #tpu.memory_space<vmem>>, %arg2: memref<4x128xf32, #tpu.memory_space<vmem>>, %arg3: memref<1x128xf32, #tpu.memory_space<vmem>>, %arg4: memref<128x128xf32, #tpu.memory_space<vmem>>, %arg5: memref<1x128xf32, #tpu.memory_space<vmem>>, %arg6: memref<128x2xf32, #tpu.memory_space<vmem>>) attributes {dimension_semantics = [#tpu.dimension_semantics<parallel>], iteration_bounds = array<i64: 2>, scalar_prefetch = 0 : i64, scratch_operands = 0 : i64, tpu.core_type = #tpu.core_type<tc>, window_params = [{transform_indices = @transform_0, window_bounds = array<i64: 128, 4>}, {pipeline_mode = #tpu.pipeline_mode<synchronous>, transform_indices = @transform_1, window_bounds = array<i64: 4, 128>}, {pipeline_mode = #tpu.pipeline_mode<synchronous>, transform_indices = @transform_2, window_bounds = array<i64: 1, 128>}, {pipeline_mode = #tpu.pipeline_mode<synchronous>, transform_indices = @transform_3, window_bounds = array<i64: 128, 128>}, {pipeline_mode = #tpu.pipeline_mode<synchronous>, transform_indices = @transform_4, window_bounds = array<i64: 1, 128>}, {transform_indices = @transform_5, window_bounds = array<i64: 128, 2>}]} {
    %c0 = arith.constant 0 : index
    %c0_0 = arith.constant 0 : index
    %0 = vector.load %arg1[%c0, %c0_0] : memref<128x4xf32, #tpu.memory_space<vmem>>, vector<128x4xf32>
    %c0_1 = arith.constant 0 : index
    %c0_2 = arith.constant 0 : index
    %1 = vector.load %arg2[%c0_1, %c0_2] : memref<4x128xf32, #tpu.memory_space<vmem>>, vector<4x128xf32>
    %2 = vector.extract_strided_slice %0 {offsets = [0, 0], sizes = [128, 1], strides = [1, 1]} : vector<128x4xf32> to vector<128x1xf32>
    %3 = vector.extract_strided_slice %1 {offsets = [0, 0], sizes = [1, 128], strides = [1, 1]} : vector<4x128xf32> to vector<1x128xf32>
    %4 = vector.broadcast %2 : vector<128x1xf32> to vector<128x128xf32>
    %5 = vector.broadcast %3 : vector<1x128xf32> to vector<128x128xf32>
    %6 = arith.mulf %4, %5 : vector<128x128xf32>
    %c0_3 = arith.constant 0 : index
    %c0_4 = arith.constant 0 : index
    %7 = vector.load %arg3[%c0_3, %c0_4] : memref<1x128xf32, #tpu.memory_space<vmem>>, vector<1x128xf32>
    %8 = vector.broadcast %7 : vector<1x128xf32> to vector<128x128xf32>
    %9 = arith.addf %6, %8 : vector<128x128xf32>
    %10 = vector.extract_strided_slice %0 {offsets = [0, 1], sizes = [128, 1], strides = [1, 1]} : vector<128x4xf32> to vector<128x1xf32>
    %11 = vector.extract_strided_slice %1 {offsets = [1, 0], sizes = [1, 128], strides = [1, 1]} : vector<4x128xf32> to vector<1x128xf32>
    %12 = vector.broadcast %10 : vector<128x1xf32> to vector<128x128xf32>
    %13 = vector.broadcast %11 : vector<1x128xf32> to vector<128x128xf32>
    %14 = arith.mulf %12, %13 : vector<128x128xf32>
    %15 = arith.addf %9, %14 : vector<128x128xf32>
    %16 = vector.extract_strided_slice %0 {offsets = [0, 2], sizes = [128, 1], strides = [1, 1]} : vector<128x4xf32> to vector<128x1xf32>
    %17 = vector.extract_strided_slice %1 {offsets = [2, 0], sizes = [1, 128], strides = [1, 1]} : vector<4x128xf32> to vector<1x128xf32>
    %18 = vector.broadcast %16 : vector<128x1xf32> to vector<128x128xf32>
    %19 = vector.broadcast %17 : vector<1x128xf32> to vector<128x128xf32>
    %20 = arith.mulf %18, %19 : vector<128x128xf32>
    %21 = arith.addf %15, %20 : vector<128x128xf32>
    %22 = vector.extract_strided_slice %0 {offsets = [0, 3], sizes = [128, 1], strides = [1, 1]} : vector<128x4xf32> to vector<128x1xf32>
    %23 = vector.extract_strided_slice %1 {offsets = [3, 0], sizes = [1, 128], strides = [1, 1]} : vector<4x128xf32> to vector<1x128xf32>
    %24 = vector.broadcast %22 : vector<128x1xf32> to vector<128x128xf32>
    %25 = vector.broadcast %23 : vector<1x128xf32> to vector<128x128xf32>
    %26 = arith.mulf %24, %25 : vector<128x128xf32>
    %27 = arith.addf %21, %26 : vector<128x128xf32>
    %cst = arith.constant 0.000000e+00 : f32
    %28 = vector.broadcast %cst : f32 to vector<128x128xf32>
    %29 = arith.maximumf %27, %28 : vector<128x128xf32>
    %c0_5 = arith.constant 0 : index
    %c0_6 = arith.constant 0 : index
    %30 = vector.load %arg4[%c0_5, %c0_6] : memref<128x128xf32, #tpu.memory_space<vmem>>, vector<128x128xf32>
    %cst_7 = arith.constant dense<0.000000e+00> : vector<128x128xf32>
    %31 = tpu.matmul %29, %30, %cst_7 {dimension_numbers = #tpu.dot_dimension_numbers<[1], [0], [0], [1], [0, 0, 1, 1], [], []>} : vector<128x128xf32>, vector<128x128xf32>, vector<128x128xf32> -> vector<128x128xf32>
    %c0_8 = arith.constant 0 : index
    %c0_9 = arith.constant 0 : index
    %32 = vector.load %arg5[%c0_8, %c0_9] : memref<1x128xf32, #tpu.memory_space<vmem>>, vector<1x128xf32>
    %33 = vector.broadcast %32 : vector<1x128xf32> to vector<128x128xf32>
    %34 = arith.addf %31, %33 : vector<128x128xf32>
    %35 = vector.extract_strided_slice %34 {offsets = [0, 0], sizes = [128, 2], strides = [1, 1]} : vector<128x128xf32> to vector<128x2xf32>
    %c0_10 = arith.constant 0 : index
    %c0_11 = arith.constant 0 : index
    %36 = vector.load %arg6[%c0_10, %c0_11] : memref<128x2xf32, #tpu.memory_space<vmem>>, vector<128x2xf32>
    tpu.vector_store %arg6[%c0_10, %c0_11], %35 {strides = array<i32>} : memref<128x2xf32, #tpu.memory_space<vmem>>, vector<128x2xf32>,
    return
  }
  func.func @transform_0(%arg0: i32) -> (i32, i32) {
    %c0_i32 = arith.constant 0 : i32
    %c0_i32_0 = arith.constant 0 : i32
    return %arg0, %c0_i32 : i32, i32
  }
  func.func @transform_1(%arg0: i32) -> (i32, i32) {
    %c0_i32 = arith.constant 0 : i32
    %c0_i32_0 = arith.constant 0 : i32
    %c0_i32_1 = arith.constant 0 : i32
    return %c0_i32, %c0_i32_0 : i32, i32
  }
  func.func @transform_2(%arg0: i32) -> (i32, i32) {
    %c0_i32 = arith.constant 0 : i32
    %c0_i32_0 = arith.constant 0 : i32
    %c0_i32_1 = arith.constant 0 : i32
    return %c0_i32, %c0_i32_0 : i32, i32
  }
  func.func @transform_3(%arg0: i32) -> (i32, i32) {
    %c0_i32 = arith.constant 0 : i32
    %c0_i32_0 = arith.constant 0 : i32
    %c0_i32_1 = arith.constant 0 : i32
    return %c0_i32, %c0_i32_0 : i32, i32
  }
  func.func @transform_4(%arg0: i32) -> (i32, i32) {
    %c0_i32 = arith.constant 0 : i32
    %c0_i32_0 = arith.constant 0 : i32
    %c0_i32_1 = arith.constant 0 : i32
    return %c0_i32, %c0_i32_0 : i32, i32
  }
  func.func @transform_5(%arg0: i32) -> (i32, i32) {
    %c0_i32 = arith.constant 0 : i32
    %c0_i32_0 = arith.constant 0 : i32
    return %arg0, %c0_i32 : i32, i32
  }
}

</mosaic_0001>

<bundles_post_ra>
// kernel: tpu_custom_call.1
= control target key start
LH: loop header
LB: loop body
LE: loop exit
PB: predicated region body
PF: predicated region fallthrough
CT: control target
= control target key end

     0   :  { %s1144_s18 = smov 0   ;;  %s1540_s0 = inlined_call_operand.vmem [shape: f32[256,4], index: 0, kind: input, shape index: {}]   ;;  %s1541_s1 = inlined_call_operand.vmem [shape: f32[4,128], index: 1, kind: input, shape index: {}]   ;;  %s1542_s2 = inlined_call_operand.vmem [shape: f32[1,128], index: 2, kind: input, shape index: {}]   ;;  %s1543_s3 = inlined_call_operand.vmem [shape: f32[128,128], index: 3, kind: input, shape index: {}]   ;;  %s1544_s4 = inlined_call_operand.vmem [shape: f32[1,128], index: 4, kind: input, shape index: {}]   ;;  %s1545_s5 = inlined_call_operand.vmem [shape: f32[256,2], index: 5, kind: output, shape index: {}]  }
   0x1 LB: > { %s925_s19 = sadd.s32 4294967295, %s1108_s18   ;;  %p929_p0 = scmp.ge.s32.totalorder %s1108_s18, 1  ;;  %s1108_s18 = sphi %s1144_s18, %s15_s18  }
   0x2   : > { %p188_p1 = scmp.lt.s32.totalorder %s1108_s18, 3 }
   0x4   : > { %p189_p2 = pnand %p929_p0, %p188_p1 }
   0x5   : > { %s930_s20 = sshll.u32 (!%p189_p2), %s925_s19, 4 }
   0x6   : > { %192 = sbr.rel (%p189_p2) target bundleno = 522 (0x20a), region = 40  ;;  %p217_p3 = scmp.lt.s32.totalorder (!%p189_p2), %s930_s20, 31 }
   0xb   : > { %v1110_v0 = vmov 0   ;;  %s1547_s20 = smov (!%p217_p3, %s930_s20), 31  ;;  %v1111_v6 = vmov 1   ;;  %v1112_v12 = vmov 2   ;;  %v699_v15 = vld [vmem:[%s1543_s3 + $0x78] sm:$0xff]  ;;  %v698_v16 = vld [vmem:[%s1543_s3 + $0x70] sm:$0xff]  ;;  %v325_v47 = vlaneseq }
   0xc   : > { %1071 = vset.pattern.permute.xlu1 %v1110_v0  ;;  %1070 = vset.pattern.permute.xlu0 %v1110_v0  ;;  %s931_s21 = sshll.u32 %s1547_s20, 3  ;;  %v697_v17 = vld [vmem:[%s1543_s3 + $0x68] sm:$0xff]  ;;  %v696_v18 = vld [vmem:[%s1543_s3 + $0x60] sm:$0xff]  ;;  %v695_v19 = vld [vmem:[%s1543_s3 + $0x58] sm:$0xff]  ;;  %v1113_v23 = vmov 3   ;;  %vm852_vm0 = vcmask 15360  }
   0xd   : > { %s1162_s24 = scalar_lea.vmem %s1540_s0, %s931_s21  ;;  %1026 = vmatprep.subr.mxu1 %v699_v15  ;;  %970 = vmatprep.subr.mxu0 %v699_v15  ;;  %v694_v20 = vld [vmem:[%s1543_s3 + $0x50] sm:$0xff]  ;;  %v693_v21 = vld [vmem:[%s1543_s3 + $0x48] sm:$0xff]  ;;  %v692_v22 = vld [vmem:[%s1543_s3 + $0x40] sm:$0xff]  ;;  %v326_v50 = vshrl.u32 %v325_v47, 7  ;;  %s1503_s19 = scalar_lea.vmem %s1545_s5, %s931_s21 }
   0xe   : > { %v1165_v1 = vld [vmem:[%s1162_s24 + $0x8] sm:$0xff]  ;;  %v1168_v2 = vld [vmem:[%s1162_s24] sm:$0xff]  ;;  %v1181_v5 = vld [vmem:[%s1162_s24 + $0x50] sm:$0xff]  ;;  %1042 = vmatpush3.msra.mxu1 %v699_v15  ;;  %971 = vmatpush3.msra.mxu0 %v699_v15 }
   0xf   : > { %252 = vperm.xlu1 %1071, %v1165_v1   ;;  %247 = vperm.xlu0 %1070, %v1168_v2   ;;  %v1173_v3 = vld [vmem:[%s1162_s24 + $0x48] sm:$0xff]  ;;  %v1176_v4 = vld [vmem:[%s1162_s24 + $0x40] sm:$0xff]  ;;  %v1187_v7 = vld [vmem:[%s1162_s24 + $0x18] sm:$0xff]  ;;  %v327_v53 = vsub.s32 0, %v326_v50  ;;  %v434_v58 = vsub.s32 1, %v326_v50  ;;  %v534_v63 = vsub.s32 2, %v326_v50 }
  0x10   : > { %v1192_v8 = vld [vmem:[%s1162_s24 + $0x60] sm:$0xff]  ;;  %v1195_v9 = vld [vmem:[%s1162_s24 + $0x10] sm:$0xff]  ;;  %v1200_v10 = vld [vmem:[%s1162_s24 + $0x28] sm:$0xff]  ;;  %1027 = vmatprep.subr.mxu1 %v698_v16  ;;  %972 = vmatprep.subr.mxu0 %v698_v16 }
  0x11   : > { %v1205_v11 = vld [vmem:[%s1162_s24 + $0x70] sm:$0xff]  ;;  %v1211_v13 = vld [vmem:[%s1162_s24 + $0x38] sm:$0xff]  ;;  %1043 = vmatpush3.msra.mxu1 %v698_v16  ;;  %973 = vmatpush3.msra.mxu0 %v698_v16  ;;  %v689_v26 = vld [vmem:[%s1543_s3 + $0x28] sm:$0xff] }
  0x12   : > { %v1216_v14 = vld [vmem:[%s1162_s24 + $0x58] sm:$0xff]  ;;  %1028 = vmatprep.subr.mxu1 %v697_v17  ;;  %974 = vmatprep.subr.mxu0 %v697_v17  ;;  %v690_v25 = vld [vmem:[%s1543_s3 + $0x30] sm:$0xff]  ;;  %v688_v27 = vld [vmem:[%s1543_s3 + $0x20] sm:$0xff] }
  0x13   : > { %292 = vperm.xlu1 %1071, %v1173_v3   ;;  %287 = vperm.xlu0 %1070, %v1176_v4   ;;  %v691_v24 = vld [vmem:[%s1543_s3 + $0x38] sm:$0xff]  ;;  %v686_v29 = vld [vmem:[%s1543_s3 + $0x10] sm:$0xff]  ;;  %v685_v30 = vld [vmem:[%s1543_s3 + $0x8] sm:$0xff] }
  0x14   : > { %1044 = vmatpush3.msra.mxu1 %v697_v17  ;;  %975 = vmatpush3.msra.mxu0 %v697_v17  ;;  %v687_v28 = vld [vmem:[%s1543_s3 + $0x18] sm:$0xff]  ;;  %v1286_v31 = vld [vmem:[%s1162_s24 + $0x20] sm:$0xff]  ;;  %v1301_v33 = vld [vmem:[%s1162_s24 + $0x68] sm:$0xff] }
  0x15   : > { %1029 = vmatprep.subr.mxu1 %v696_v18  ;;  %976 = vmatprep.subr.mxu0 %v696_v18  ;;  %v684_v32 = vld [vmem:[%s1543_s3] sm:$0xff]  ;;  %v234_v34 = vld [vmem:[%s1162_s24 + $0x30] sm:$0xff]  ;;  %v1318_v35 = vld [vmem:[%s1162_s24 + $0x78] sm:$0xff] }
  0x16   : > { %1045 = vmatpush3.msra.mxu1 %v696_v18  ;;  %977 = vmatpush3.msra.mxu0 %v696_v18  ;;  %v244_v54 = vld [vmem:[%s1541_s1] sm:$0xf] }
  0x17   : > { %1072 = vset.pattern.permute.xlu1 %v1111_v6  ;;  %297 = vperm.xlu0 %1070, %v1181_v5   ;;  %v1358_v57 = vrot.slane %v244_v54, %v327_v53  ;;  %v1362_v62 = vrot.slane %v244_v54, %v434_v58 }
  0x18   : > { %401 = vperm.xlu1 %1072, %v1176_v4   ;;  %1030 = vmatprep.subr.mxu1 %v695_v19 }
  0x19   : > { %1046 = vmatpush3.msra.mxu1 %v695_v19  ;;  %978 = vmatprep.subr.mxu0 %v695_v19 }
  0x1a   : > { %1031 = vmatprep.subr.mxu1 %v694_v20  ;;  %979 = vmatpush3.msra.mxu0 %v695_v19 }
  0x1b   : > { %262 = vperm.xlu0 %1070, %v1187_v7   ;;  %1047 = vmatpush3.msra.mxu1 %v694_v20 }
  0x1c   : > { %373 = vperm.xlu1 %1072, %v1165_v1   ;;  %1032 = vmatprep.subr.mxu1 %v693_v21 }
  0x1d   : > { %1048 = vmatpush3.msra.mxu1 %v693_v21  ;;  %980 = vmatprep.subr.mxu0 %v694_v20 }
  0x1e   : > { %1033 = vmatprep.subr.mxu1 %v692_v22  ;;  %981 = vmatpush3.msra.mxu0 %v694_v20 }
  0x1f   : > { %307 = vperm.xlu0 %1070, %v1192_v8   ;;  %1049 = vmatpush3.msra.mxu1 %v692_v22 }
  0x20   : > { %1073 = vset.pattern.permute.xlu1 %v1110_v0  ;;  %1034 = vmatprep.subr.mxu1 %v691_v24 }
  0x21   : > { %257 = vperm.xlu1 %1073, %v1195_v9   ;;  %1050 = vmatpush3.msra.mxu1 %v691_v24 }
  0x22   : > { %1035 = vmatprep.subr.mxu1 %v690_v25  ;;  %982 = vmatprep.subr.mxu0 %v693_v21 }
  0x23   : > { %272 = vperm.xlu0 %1070, %v1200_v10   ;;  %1051 = vmatpush3.msra.mxu1 %v690_v25 }
  0x24   : > { %1036 = vmatprep.subr.mxu1 %v689_v26  ;;  %983 = vmatpush3.msra.mxu0 %v693_v21 }
  0x25   : > { %1074 = vset.pattern.permute.xlu1 %v1112_v12  ;;  %1052 = vmatpush3.msra.mxu1 %v689_v26 }
  0x26   : > { %469 = vperm.xlu1 %1074, %v1168_v2   ;;  %1037 = vmatprep.subr.mxu1 %v688_v27 }
  0x27   : > { %317 = vperm.xlu0 %1070, %v1205_v11   ;;  %1053 = vmatpush3.msra.mxu1 %v688_v27 }
  0x28   : > { %1038 = vmatprep.subr.mxu1 %v687_v28  ;;  %984 = vmatprep.subr.mxu0 %v692_v22 }
  0x29   : > { %1054 = vmatpush3.msra.mxu1 %v687_v28  ;;  %985 = vmatpush3.msra.mxu0 %v692_v22 }
  0x2a   : > { %501 = vperm.xlu1 %1074, %v1176_v4   ;;  %1039 = vmatprep.subr.mxu1 %v686_v29 }
  0x2b   : > { %282 = vperm.xlu0 %1070, %v1211_v13   ;;  %1055 = vmatpush3.msra.mxu1 %v686_v29 }
  0x2c   : > { %1040 = vmatprep.subr.mxu1 %v685_v30  ;;  %986 = vmatprep.subr.mxu0 %v691_v24 }
  0x2d   : > { %1056 = vmatpush3.msra.mxu1 %v685_v30  ;;  %987 = vmatpush3.msra.mxu0 %v691_v24 }
  0x2e   : > { %1075 = vset.pattern.permute.xlu1 %v1110_v0  ;;  %1041 = vmatprep.subr.mxu1 %v684_v32 }
  0x2f   : > { %302 = vperm.xlu1 %1075, %v1216_v14   ;;  %1091 = vset.pattern.permute.xlu0 %v1111_v6 }
  0x30   : > { %369 = vperm.xlu0 %1091, %v1168_v2   ;;  %1057 = vmatpush3.msra.mxu1 %v684_v32 }
  0x31   : > { %988 = vmatprep.subr.mxu0 %v690_v25 }
  0x32   : > { %989 = vmatpush3.msra.mxu0 %v690_v25 }
  0x33   : > { %1076 = vset.pattern.permute.xlu1 %v1112_v12  ;;  %990 = vmatprep.subr.mxu0 %v689_v26 }
  0x34   : > { %505 = vperm.xlu1 %1076, %v1173_v3   ;;  %405 = vperm.xlu0 %1091, %v1173_v3  }
  0x35   : > { %991 = vmatpush3.msra.mxu0 %v689_v26 }
  0x36   : > { %992 = vmatprep.subr.mxu0 %v688_v27 }
  0x37   : > { %993 = vmatpush3.msra.mxu0 %v688_v27 }
  0x38   : > { %1077 = vset.pattern.permute.xlu1 %v1111_v6  ;;  %409 = vperm.xlu0 %1091, %v1181_v5  }
  0x39   : > { %377 = vperm.xlu1 %1077, %v1195_v9   ;;  %994 = vmatprep.subr.mxu0 %v687_v28 }
  0x3a   : > { %995 = vmatpush3.msra.mxu0 %v687_v28 }
  0x3b   : > { %996 = vmatprep.subr.mxu0 %v686_v29 }
  0x3c   : > { %381 = vperm.xlu0 %1091, %v1187_v7   ;;  %997 = vmatpush3.msra.mxu0 %v686_v29 }
  0x3d   : > { %1078 = vset.pattern.permute.xlu1 %v1113_v23  ;;  %998 = vmatprep.subr.mxu0 %v685_v30 }
  0x3e   : > { %569 = vperm.xlu1 %1078, %v1168_v2   ;;  %999 = vmatpush3.msra.mxu0 %v685_v30 }
  0x3f   : > { %1000 = vmatprep.subr.mxu0 %v684_v32 }
  0x40   : > { %417 = vperm.xlu0 %1091, %v1192_v8   ;;  %1001 = vmatpush3.msra.mxu0 %v684_v32 }
  0x42   : > { %601 = vperm.xlu1 %1078, %v1176_v4  }
  0x44   : > { %389 = vperm.xlu0 %1091, %v1200_v10  }
  0x46   : > { %1079 = vset.pattern.permute.xlu1 %v1111_v6 }
  0x47   : > { %413 = vperm.xlu1 %1079, %v1216_v14  }
  0x48   : > { %425 = vperm.xlu0 %1091, %v1205_v11  }
  0x4b   : > { %1080 = vset.pattern.permute.xlu1 %v1113_v23 }
  0x4c   : > { %605 = vperm.xlu1 %1080, %v1173_v3   ;;  %397 = vperm.xlu0 %1091, %v1211_v13   ;;  %v634_v3 = vsub.s32 3, %v326_v50 }
  0x50   : > { %1081 = vset.pattern.permute.xlu1 %v1110_v0  ;;  %1096 = vset.pattern.permute.xlu0 %v1112_v12 }
  0x51   : > { %267 = vperm.xlu1 %1081, %v1286_v31   ;;  %473 = vperm.xlu0 %1096, %v1165_v1  }
  0x55   : > { %1082 = vset.pattern.permute.xlu1 %v1112_v12  ;;  %481 = vperm.xlu0 %1096, %v1187_v7  }
  0x56   : > { %477 = vperm.xlu1 %1082, %v1195_v9  }
  0x59   : > { %489 = vperm.xlu0 %1096, %v1200_v10  }
  0x5a   : > { %509 = vperm.xlu1 %1082, %v1181_v5  }
  0x5d   : > { %525 = vperm.xlu0 %1096, %v1205_v11  }
  0x5e   : > { %1083 = vset.pattern.permute.xlu1 %v1110_v0 }
  0x5f   : > { %312 = vperm.xlu1 %1083, %v1301_v33  }
  0x61   : > { %1100 = vset.pattern.permute.xlu0 %v1113_v23 }
  0x62   : > { %573 = vperm.xlu0 %1100, %v1165_v1  }
  0x63   : > { %1084 = vset.pattern.permute.xlu1 %v1112_v12 }
  0x64   : > { %513 = vperm.xlu1 %1084, %v1216_v14  }
  0x66   : > { %581 = vperm.xlu0 %1100, %v1187_v7  }
  0x68   : > { %1085 = vset.pattern.permute.xlu1 %v1111_v6 }
  0x69   : > { %385 = vperm.xlu1 %1085, %v1286_v31  }
  0x6a   : > { %589 = vperm.xlu0 %1100, %v1200_v10   ;;  %v1381_v10 = vrot.slane %v244_v54, %v634_v3 }
  0x6d   : > { %1086 = vset.pattern.permute.xlu1 %v1113_v23 }
  0x6e   : > { %577 = vperm.xlu1 %1086, %v1195_v9   ;;  %593 = vperm.xlu0 %1100, %v234_v34  }
  0x72   : > { %609 = vperm.xlu1 %1086, %v1181_v5   ;;  %629 = vperm.xlu0 %1100, %v1318_v35  }
  0x76   : > { %1087 = vset.pattern.permute.xlu1 %v1111_v6 }
  0x77   : > { %421 = vperm.xlu1 %1087, %v1301_v33  }
  0x7b   : > { %1088 = vset.pattern.permute.xlu1 %v1113_v23 }
  0x7c   : > { %613 = vperm.xlu1 %1088, %v1216_v14  }
  0x80   : > { %1089 = vset.pattern.permute.xlu1 %v1110_v0 }
  0x81   : > { %277 = vperm.xlu1 %1089, %v234_v34  }
  0x85   : > { %1090 = vset.pattern.permute.xlu1 %v1112_v12 }
  0x86   : > { %485 = vperm.xlu1 %1090, %v1286_v31  }
  0x8a   : > { %v1329_v36 = vpop.permute.xlu1 %252  ;;  %517 = vperm.xlu1 %1090, %v1192_v8   ;;  %v248_v37 = vpop.permute.xlu0 %247 }
  0x8b   : > { %v329_v59 = vmul.f32 %v1358_v57, %v248_v37 }
  0x8e   : > { %v1332_v38 = vpop.permute.xlu1 %292  ;;  %1092 = vset.pattern.permute.xlu1 %v1110_v0  ;;  %v288_v39 = vpop.permute.xlu0 %287  ;;  %v1368_v0 = vld [vmem:[%s1542_s2] ss:$0 sm:$0xff] }
  0x8f   : > { %322 = vperm.xlu1 %1092, %v1318_v35   ;;  %v352_v1 = vadd.f32 %v1368_v0, %v329_v59  ;;  %v337_v5 = vmul.f32 %v1358_v57, %v288_v39  ;;  %v338_v28 = vmul.f32 %v1358_v57, %v1332_v38 }
  0x91   : > { %v360_v14 = vadd.f32 %v1368_v0, %v337_v5 }
  0x92   : > { %v1336_v40 = vpop.permute.xlu0 %297 }
  0x93   : > { %v402_v41 = vpop.permute.xlu1 %401  ;;  %1093 = vset.pattern.permute.xlu1 %v1112_v12 }
  0x94   : > { %521 = vperm.xlu1 %1093, %v1301_v33   ;;  %v444_v15 = vmul.f32 %v1362_v62, %v402_v41 }
  0x96   : > { %v1340_v42 = vpop.permute.xlu0 %262  ;;  %v460_v25 = vadd.f32 %v444_v15, %v360_v14 }
  0x97   : > { %v1342_v43 = vpop.permute.xlu1 %373 }
  0x98   : > { %1094 = vset.pattern.permute.xlu1 %v1111_v6 }
  0x99   : > { %393 = vperm.xlu1 %1094, %v234_v34  }
  0x9a   : > { %v308_v44 = vpop.permute.xlu0 %307 }
  0x9c   : > { %v1345_v45 = vpop.permute.xlu1 %257 }
  0x9d   : > { %1095 = vset.pattern.permute.xlu1 %v1113_v23 }
  0x9e   : > { %585 = vperm.xlu1 %1095, %v1286_v31   ;;  %v273_v46 = vpop.permute.xlu0 %272 }
  0x9f   : > { %v334_v17 = vmul.f32 %v1358_v57, %v273_v46 }
  0xa1   : > { %v470_v48 = vpop.permute.xlu1 %469  ;;  %v357_v29 = vadd.f32 %v1368_v0, %v334_v17 }
  0xa2   : > { %617 = vperm.xlu1 %1095, %v1192_v8   ;;  %v318_v49 = vpop.permute.xlu0 %317  ;;  %v341_v8 = vmul.f32 %v1358_v57, %v308_v44  ;;  %v361_v44 = vadd.f32 %v1368_v0, %v338_v28 }
  0xa3   : > { %v343_v30 = vmul.f32 %v1358_v57, %v318_v49 }
  0xa4   : > { %v364_v19 = vadd.f32 %v1368_v0, %v341_v8 }
  0xa5   : > { %v502_v51 = vpop.permute.xlu1 %501 }
  0xa6   : > { %1097 = vset.pattern.permute.xlu1 %v1111_v6  ;;  %v283_v52 = vpop.permute.xlu0 %282  ;;  %v1375_v6 = vrot.slane %v244_v54, %v534_v63 }
  0xa7   : > { %429 = vperm.xlu1 %1097, %v1318_v35   ;;  %v336_v46 = vmul.f32 %v1358_v57, %v283_v52 }
  0xa8   : > { %v536_v16 = vmul.f32 %v1375_v6, %v470_v48  ;;  %v544_v20 = vmul.f32 %v1375_v6, %v502_v51 }
  0xa9   : > { %v359_v53 = vadd.f32 %v1368_v0, %v336_v46 }
  0xaa   : > { %v1355_v55 = vpop.permute.xlu1 %302 }
  0xab   : > { %1098 = vset.pattern.permute.xlu1 %v1113_v23  ;;  %v370_v56 = vpop.permute.xlu0 %369 }
  0xac   : > { %621 = vperm.xlu1 %1098, %v1301_v33   ;;  %v436_v2 = vmul.f32 %v1362_v62, %v370_v56 }
  0xae   : > { %v452_v9 = vadd.f32 %v436_v2, %v352_v1 }
  0xaf   : > { %v506_v60 = vpop.permute.xlu1 %505  ;;  %v406_v61 = vpop.permute.xlu0 %405 }
  0xb0   : > { %1099 = vset.pattern.permute.xlu1 %v1112_v12  ;;  %v552_v22 = vadd.f32 %v536_v16, %v452_v9  ;;  %v445_v39 = vmul.f32 %v1362_v62, %v406_v61  ;;  %v545_v54 = vmul.f32 %v1375_v6, %v506_v60  ;;  %v330_v16 = vmul.f32 %v1358_v57, %v1329_v36 }
  0xb1   : > { %493 = vperm.xlu1 %1099, %v234_v34  }
  0xb2   : > { %v461_v50 = vadd.f32 %v445_v39, %v361_v44 }
  0xb3   : > { %v1372_v4 = vpop.permute.xlu0 %409 }
  0xb4   : > { %v1377_v7 = vpop.permute.xlu1 %377  ;;  %v561_v61 = vadd.f32 %v545_v54, %v461_v50 }
  0xb5   : > { %497 = vperm.xlu1 %1099, %v1211_v13  }
  0xb7   : > { %v1383_v12 = vpop.permute.xlu0 %381 }
  0xb9   : > { %529 = vperm.xlu1 %1099, %v1318_v35   ;;  %v570_v18 = vpop.permute.xlu1 %569  ;;  %v560_v35 = vadd.f32 %v544_v20, %v460_v25  ;;  %v332_v25 = vmul.f32 %v1358_v57, %v1340_v42  ;;  %v331_v42 = vmul.f32 %v1358_v57, %v1345_v45 }
  0xba   : > { %v636_v21 = vmul.f32 %v1381_v10, %v570_v18  ;;  %v437_v18 = vmul.f32 %v1362_v62, %v1342_v43 }
  0xbb   : > { %v418_v24 = vpop.permute.xlu0 %417  ;;  %v355_v43 = vadd.f32 %v1368_v0, %v332_v25 }
  0xbc   : > { %v448_v26 = vmul.f32 %v1362_v62, %v418_v24  ;;  %v652_v27 = vadd.f32 %v636_v21, %v552_v22  ;;  %v353_v21 = vadd.f32 %v1368_v0, %v330_v16 }
  0xbd   : > { %1101 = vset.pattern.permute.xlu1 %v1113_v23  ;;  %v602_v31 = vpop.permute.xlu1 %601  ;;  %v366_v23 = vadd.f32 %v1368_v0, %v343_v30  ;;  %v439_v30 = vmul.f32 %v1362_v62, %v1383_v12 }
  0xbe   : > { %v1399_v32 = vadd.f32 %v448_v26, %v364_v19  ;;  %v644_v33 = vmul.f32 %v1381_v10, %v602_v31  ;;  %625 = vperm.xlu1 %1101, %v1205_v11   ;;  %v668_v34 = vmax.f32 %v652_v27, 0.0  ;;  %v453_v36 = vadd.f32 %v437_v18, %v353_v21 }
  0xbf   : > { %v390_v37 = vpop.permute.xlu0 %389 }
  0xc0   : > { %1002 = vmatprep.mubr.f32.mxu0 %v668_v34  ;;  %v441_v38 = vmul.f32 %v1362_v62, %v390_v37  ;;  %v660_v41 = vadd.f32 %v644_v33, %v560_v35  ;;  %v339_v34 = vmul.f32 %v1358_v57, %v1336_v40  ;;  %v455_v37 = vadd.f32 %v439_v30, %v355_v43 }
  0xc1   : > { %v446_v40 = vmul.f32 %v1362_v62, %v1372_v4 }
  0xc2   : > { %v457_v47 = vadd.f32 %v441_v38, %v357_v29  ;;  %597 = vperm.xlu1 %1101, %v1211_v13   ;;  %v1409_v48 = vpop.permute.xlu1 %413  ;;  %v676_v11 = vmax.f32 %v660_v41, 0.0  ;;  %v438_v38 = vmul.f32 %v1362_v62, %v1377_v7  ;;  %v362_v12 = vadd.f32 %v1368_v0, %v339_v34 }
  0xc3   : > { %v426_v49 = vpop.permute.xlu0 %425 }
  0xc4   : > { %1014 = vmatprep.mubr.f32.mxu1 %v676_v11  ;;  %v450_v51 = vmul.f32 %v1362_v62, %v426_v49  ;;  %v462_v50 = vadd.f32 %v446_v40, %v362_v12 }
  0xc6   : > { %v466_v56 = vadd.f32 %v450_v51, %v366_v23  ;;  %v354_v23 = vadd.f32 %v1368_v0, %v331_v42 }
  0xc7   : > { %v606_v58 = vpop.permute.xlu1 %605  ;;  %v398_v59 = vpop.permute.xlu0 %397 }
  0xc8   : > { %v645_v52 = vmul.f32 %v1381_v10, %v606_v58  ;;  %v443_v13 = vmul.f32 %v1362_v62, %v398_v59  ;;  %v454_v11 = vadd.f32 %v438_v38, %v354_v23 }
  0xca   : > { %v661_v63 = vadd.f32 %v645_v52, %v561_v61  ;;  %v1416_v1 = vadd.f32 %v443_v13, %v359_v53  ;;  %v340_v13 = vmul.f32 %v1358_v57, %v1355_v55 }
  0xcc   : > { %v677_v2 = vmax.f32 %v661_v63, 0.0  ;;  %v1418_v3 = vpop.permute.xlu1 %267  ;;  %v474_v5 = vpop.permute.xlu0 %473 }
  0xcd   : > { %v537_v22 = vmul.f32 %v1375_v6, %v474_v5 }
  0xce   : > { %1015 = vmatmul.mubr.f32.vlgmr.msra.gmra.mxu1 %v677_v2  ;;  %v447_v2 = vmul.f32 %v1362_v62, %v1409_v48 }
  0xcf   : > { %v553_v28 = vadd.f32 %v537_v22, %v453_v36  ;;  %v333_v36 = vmul.f32 %v1358_v57, %v1418_v3 }
  0xd0   : > { %v482_v8 = vpop.permute.xlu0 %481 }
  0xd1   : > { %v478_v9 = vpop.permute.xlu1 %477  ;;  %v539_v39 = vmul.f32 %v1375_v6, %v482_v8  ;;  %v356_v43 = vadd.f32 %v1368_v0, %v333_v36 }
  0xd2   : > { %v538_v46 = vmul.f32 %v1375_v6, %v478_v9  ;;  %v363_v9 = vadd.f32 %v1368_v0, %v340_v13 }
  0xd3   : > { %v555_v45 = vadd.f32 %v539_v39, %v455_v37 }
  0xd4   : > { %v490_v14 = vpop.permute.xlu0 %489  ;;  %v554_v51 = vadd.f32 %v538_v46, %v454_v11 }
  0xd5   : > { %v510_v60 = vpop.permute.xlu1 %509  ;;  %v541_v15 = vmul.f32 %v1375_v6, %v490_v14 }
  0xd6   : > { %v546_v7 = vmul.f32 %v1375_v6, %v510_v60  ;;  %v463_v60 = vadd.f32 %v447_v2, %v363_v9 }
  0xd7   : > { %v1423_v17 = vadd.f32 %v541_v15, %v457_v47 }
  0xd8   : > { %v526_v19 = vpop.permute.xlu0 %525  ;;  %v562_v59 = vadd.f32 %v546_v7, %v462_v50 }
  0xd9   : > { %v550_v20 = vmul.f32 %v1375_v6, %v526_v19 }
  0xda   : > { %v1430_v24 = vpop.permute.xlu1 %312 }
  0xdb   : > { %v1434_v26 = vadd.f32 %v550_v20, %v466_v56  ;;  %v342_v40 = vmul.f32 %v1358_v57, %v1430_v24 }
  0xdd   : > { %v574_v27 = vpop.permute.xlu0 %573 }
  0xde   : > { %v637_v29 = vmul.f32 %v1381_v10, %v574_v27 }
  0xdf   : > { %v514_v31 = vpop.permute.xlu1 %513 }
  0xe0   : > { %v653_v33 = vadd.f32 %v637_v29, %v553_v28  ;;  %v547_v14 = vmul.f32 %v1375_v6, %v514_v31 }
  0xe1   : > { %v582_v41 = vpop.permute.xlu0 %581 }
  0xe2   : > { %v669_v35 = vmax.f32 %v653_v33, 0.0  ;;  %v639_v47 = vmul.f32 %v1381_v10, %v582_v41  ;;  %v563_v16 = vadd.f32 %v547_v14, %v463_v60 }
  0xe4   : > { %v386_v44 = vpop.permute.xlu1 %385  ;;  %1003 = vmatmul.mubr.f32.vlgmr.msra.gmra.mxu0 %v669_v35  ;;  %v655_v54 = vadd.f32 %v639_v47, %v555_v45 }
  0xe5   : > { %v440_v27 = vmul.f32 %v1362_v62, %v386_v44  ;;  %v590_v28 = vpop.permute.xlu0 %589 }
  0xe6   : > { %v671_v52 = vmax.f32 %v655_v54, 0.0  ;;  %v641_v31 = vmul.f32 %v1381_v10, %v590_v28 }
  0xe7   : > { %v456_v33 = vadd.f32 %v440_v27, %v356_v43 }
  0xe8   : > { %v657_v39 = vadd.f32 %v641_v31, %v1423_v17  ;;  %v365_v17 = vadd.f32 %v1368_v0, %v342_v40 }
  0xe9   : > { %v578_v49 = vpop.permute.xlu1 %577 }
  0xea   : > { %v638_v53 = vmul.f32 %v1381_v10, %v578_v49  ;;  %v673_v23 = vmax.f32 %v657_v39, 0.0 }
  0xec   : > { %v654_v56 = vadd.f32 %v638_v53, %v554_v51 }
  0xed   : > { %v610_v58 = vpop.permute.xlu1 %609 }
  0xee   : > { %v670_v61 = vmax.f32 %v654_v56, 0.0  ;;  %v646_v4 = vmul.f32 %v1381_v10, %v610_v58 }
  0xf0   : > { %v662_v63 = vadd.f32 %v646_v4, %v562_v59  ;;  %1005 = vmatprep.mubr.f32.mxu0 %v670_v61  ;;  %v594_v59 = vpop.permute.xlu0 %593 }
  0xf1   : > { %1006 = vmatmul.mubr.f32.gmra.mxu0 %v671_v52  ;;  %v642_v52 = vmul.f32 %v1381_v10, %v594_v59 }
  0xf2   : > { %v678_v5 = vmax.f32 %v662_v63, 0.0  ;;  %v422_v8 = vpop.permute.xlu1 %421 }
  0xf3   : > { %v449_v45 = vmul.f32 %v1362_v62, %v422_v8 }
  0xf4   : > { %1017 = vmatprep.mubr.f32.mxu1 %v678_v5 }
  0xf7   : > { %v614_v15 = vpop.permute.xlu1 %613 }
  0xf8   : > { %v647_v18 = vmul.f32 %v1381_v10, %v614_v15 }
  0xfa   : > { %v663_v19 = vadd.f32 %v647_v18, %v563_v16 }
  0xfc   : > { %v679_v55 = vmax.f32 %v663_v19, 0.0  ;;  %v278_v20 = vpop.permute.xlu1 %277  ;;  %v630_v19 = vpop.permute.xlu0 %629 }
  0xfd   : > { %v335_v50 = vmul.f32 %v1358_v57, %v278_v20  ;;  %v651_v20 = vmul.f32 %v1381_v10, %v630_v19 }
  0xfe   : > { %1018 = vmatmul.mubr.f32.gmra.mxu1 %v679_v55 }
  0xff   : > { %v358_v56 = vadd.f32 %v1368_v0, %v335_v50 }
 0x101   : > { %v486_v21 = vpop.permute.xlu1 %485 }
 0x102   : > { %v540_v30 = vmul.f32 %v1375_v6, %v486_v21 }
 0x104   : > { %v556_v42 = vadd.f32 %v540_v30, %v456_v33 }
 0x105   : > { %v518_v22 = vpop.permute.xlu1 %517 }
 0x106   : > { %v548_v35 = vmul.f32 %v1375_v6, %v518_v22 }
 0x108   : > { %v564_v41 = vadd.f32 %v548_v35, %v1399_v32  ;;  %v465_v32 = vadd.f32 %v449_v45, %v365_v17 }
 0x10a   : > { %v323_v25 = vpop.permute.xlu1 %322 }
 0x10b   : > { %v344_v63 = vmul.f32 %v1358_v57, %v323_v25 }
 0x10d   : > { %v367_v14 = vadd.f32 %v1368_v0, %v344_v63 }
 0x10f   : > { %v522_v48 = vpop.permute.xlu1 %521 }
 0x110   : > { %v549_v49 = vmul.f32 %v1375_v6, %v522_v48 }
 0x112   : > { %v565_v7 = vadd.f32 %v549_v49, %v465_v32 }
 0x114   : > { %v394_v29 = vpop.permute.xlu1 %393 }
 0x115   : > { %v442_v24 = vmul.f32 %v1362_v62, %v394_v29 }
 0x117   : > { %v458_v4 = vadd.f32 %v442_v24, %v358_v56 }
 0x119   : > { %v586_v34 = vpop.permute.xlu1 %585 }
 0x11a   : > { %v640_v37 = vmul.f32 %v1381_v10, %v586_v34 }
 0x11c   : > { %v656_v3 = vadd.f32 %v640_v37, %v556_v42 }
 0x11d   : > { %v618_v38 = vpop.permute.xlu1 %617 }
 0x11e   : > { %v672_v44 = vmax.f32 %v656_v3, 0.0  ;;  %v648_v12 = vmul.f32 %v1381_v10, %v618_v38 }
 0x120   : > { %v664_v46 = vadd.f32 %v648_v12, %v564_v41  ;;  %1008 = vmatprep.mubr.f32.mxu0 %v672_v44 }
 0x121   : > { %1009 = vmatmul.mubr.f32.gmra.mxu0 %v673_v23 }
 0x122   : > { %v680_v47 = vmax.f32 %v664_v46, 0.0  ;;  %v430_v11 = vpop.permute.xlu1 %429 }
 0x123   : > { %v451_v8 = vmul.f32 %v1362_v62, %v430_v11 }
 0x124   : > { %1020 = vmatprep.mubr.f32.mxu1 %v680_v47 }
 0x125   : > { %v467_v16 = vadd.f32 %v451_v8, %v367_v14 }
 0x127   : > { %v622_v51 = vpop.permute.xlu1 %621 }
 0x128   : > { %v649_v53 = vmul.f32 %v1381_v10, %v622_v51 }
 0x12a   : > { %v665_v54 = vadd.f32 %v649_v53, %v565_v7 }
 0x12c   : > { %v681_v58 = vmax.f32 %v665_v54, 0.0  ;;  %v494_v61 = vpop.permute.xlu1 %493 }
 0x12d   : > { %v542_v13 = vmul.f32 %v1375_v6, %v494_v61 }
 0x12e   : > { %1021 = vmatmul.mubr.f32.gmra.mxu1 %v681_v58 }
 0x12f   : > { %v558_v2 = vadd.f32 %v542_v13, %v458_v4 }
 0x130   : > { %v498_v5 = vpop.permute.xlu1 %497 }
 0x131   : > { %v658_v9 = vadd.f32 %v642_v52, %v558_v2  ;;  %v543_v57 = vmul.f32 %v1375_v6, %v498_v5 }
 0x133   : > { %v674_v60 = vmax.f32 %v658_v9, 0.0  ;;  %v559_v48 = vadd.f32 %v543_v57, %v1416_v1 }
 0x134   : > { %v530_v15 = vpop.permute.xlu1 %529 }
 0x135   : > { %v551_v18 = vmul.f32 %v1375_v6, %v530_v15  ;;  %1011 = vmatprep.mubr.f32.mxu0 %v674_v60  ;;  %v935_v6 = vld [vmem:[%s1544_s4] ss:$0 sm:$0xff] }
 0x137   : > { %v567_v55 = vadd.f32 %v551_v18, %v467_v16 }
 0x139   : > { %v626_v21 = vpop.permute.xlu1 %625  ;;  %v667_v62 = vadd.f32 %v651_v20, %v567_v55 }
 0x13a   : > { %v650_v22 = vmul.f32 %v1381_v10, %v626_v21 }
 0x13b   : > { %v683_v28 = vmax.f32 %v667_v62, 0.0 }
 0x13c   : > { %v666_v25 = vadd.f32 %v650_v22, %v1434_v26 }
 0x13d   : > { %v598_v0 = vpop.permute.xlu1 %597 }
 0x13e   : > { %v682_v36 = vmax.f32 %v666_v25, 0.0  ;;  %v643_v27 = vmul.f32 %v1381_v10, %v598_v0 }
 0x140   : > { %v659_v29 = vadd.f32 %v643_v27, %v559_v48  ;;  %1023 = vmatprep.mubr.f32.mxu1 %v682_v36 }
 0x141   : > { %1024 = vmatmul.mubr.f32.gmra.mxu1 %v683_v28 }
 0x142   : > { %v675_v43 = vmax.f32 %v659_v29, 0.0 }
 0x144   : > { %1012 = vmatmul.mubr.f32.gmra.mxu0 %v675_v43 }
 0x18e   : > { %v1016_v10 = vpop.f32.mrf.mxu1 }
 0x18f   : > { %v819_v1 = vadd.f32 %v1016_v10, %v935_v6 }
 0x190   : > { %v813_v26 = vpop.f32.mrf.mxu1 }
 0x191   : > { %862 = vst.msk [vmem:[%s1503_s19 + $0x48] sm:$0xff] %vm852_vm0, %v819_v1  ;;  %v814_v30 = vadd.f32 %v935_v6, %v813_v26 }
 0x193   : > { %861 = vst.msk [vmem:[%s1503_s19 + $0x40] sm:$0xff] %vm852_vm0, %v814_v30 }
 0x1a4   : > { %v1004_v31 = vpop.f32.mrf.mxu0 }
 0x1a5   : > { %v779_v33 = vadd.f32 %v1004_v31, %v935_v6 }
 0x1a6   : > { %v773_v34 = vpop.f32.mrf.mxu0 }
 0x1a7   : > { %854 = vst.msk [vmem:[%s1503_s19 + $0x8] sm:$0xff] %vm852_vm0, %v779_v33  ;;  %v774_v42 = vadd.f32 %v935_v6, %v773_v34 }
 0x1a9   : > { %853 = vst.msk [vmem:[%s1503_s19] sm:$0xff] %vm852_vm0, %v774_v42 }
 0x1b1   : > { %v1007_v35 = vpop.f32.mrf.mxu0 }
 0x1b2   : > { %v789_v37 = vadd.f32 %v1007_v35, %v935_v6 }
 0x1b3   : > { %v783_v39 = vpop.f32.mrf.mxu0 }
 0x1b4   : > { %856 = vst.msk [vmem:[%s1503_s19 + $0x18] sm:$0xff] %vm852_vm0, %v789_v37  ;;  %v784_v3 = vadd.f32 %v935_v6, %v783_v39 }
 0x1b6   : > { %855 = vst.msk [vmem:[%s1503_s19 + $0x10] sm:$0xff] %vm852_vm0, %v784_v3 }
 0x1be   : > { %v1019_v38 = vpop.f32.mrf.mxu1 }
 0x1bf   : > { %v829_v41 = vadd.f32 %v1019_v38, %v935_v6 }
 0x1c0   : > { %v823_v44 = vpop.f32.mrf.mxu1 }
 0x1c1   : > { %864 = vst.msk [vmem:[%s1503_s19 + $0x58] sm:$0xff] %vm852_vm0, %v829_v41  ;;  %v824_v12 = vadd.f32 %v935_v6, %v823_v44 }
 0x1c3   : > { %863 = vst.msk [vmem:[%s1503_s19 + $0x50] sm:$0xff] %vm852_vm0, %v824_v12 }
 0x1e1   : > { %v1010_v23 = vpop.f32.mrf.mxu0 }
 0x1e2   : > { %v799_v40 = vadd.f32 %v1010_v23, %v935_v6 }
 0x1e3   : > { %v793_v46 = vpop.f32.mrf.mxu0 }
 0x1e4   : > { %858 = vst.msk [vmem:[%s1503_s19 + $0x28] sm:$0xff] %vm852_vm0, %v799_v40  ;;  %v794_v45 = vadd.f32 %v935_v6, %v793_v46 }
 0x1e6   : > { %857 = vst.msk [vmem:[%s1503_s19 + $0x20] sm:$0xff] %vm852_vm0, %v794_v45 }
 0x1ee   : > { %v1022_v47 = vpop.f32.mrf.mxu1 }
 0x1ef   : > { %v839_v11 = vadd.f32 %v1022_v47, %v935_v6 }
 0x1f0   : > { %v833_v17 = vpop.f32.mrf.mxu1 }
 0x1f1   : > { %866 = vst.msk [vmem:[%s1503_s19 + $0x68] sm:$0xff] %vm852_vm0, %v839_v11  ;;  %v834_v49 = vadd.f32 %v935_v6, %v833_v17 }
 0x1f3   : > { %865 = vst.msk [vmem:[%s1503_s19 + $0x60] sm:$0xff] %vm852_vm0, %v834_v49 }
 0x201   : > { %v1025_v32 = vpop.f32.mrf.mxu1 }
 0x202   : > { %v849_v50 = vadd.f32 %v1025_v32, %v935_v6 }
 0x203   : > { %v843_v51 = vpop.f32.mrf.mxu1 }
 0x204   : > { %868 = vst.msk [vmem:[%s1503_s19 + $0x78] sm:$0xff] %vm852_vm0, %v849_v50  ;;  %v844_v7 = vadd.f32 %v935_v6, %v843_v51  ;;  %v1013_v53 = vpop.f32.mrf.mxu0 }
 0x205   : > { %v809_v24 = vadd.f32 %v1013_v53, %v935_v6 }
 0x206   : > { %867 = vst.msk [vmem:[%s1503_s19 + $0x70] sm:$0xff] %vm852_vm0, %v844_v7  ;;  %v803_v54 = vpop.f32.mrf.mxu0 }
 0x207   : > { %860 = vst.msk [vmem:[%s1503_s19 + $0x38] sm:$0xff] %vm852_vm0, %v809_v24  ;;  %v804_v56 = vadd.f32 %v935_v6, %v803_v54 }
 0x209   : > { %859 = vst.msk [vmem:[%s1503_s19 + $0x30] sm:$0xff] %vm852_vm0, %v804_v56 }
 0x20a PF: > { %s15_s18 = sadd.s32 1, %s1108_s18  }
 0x20b   : > { %p12_p4 = scmp.ge.s32.totalorder %s15_s18, 4  }
 0x20d   :  { %14 = sbr.rel (!%p12_p4) target bundleno = 1 (0x1), region = 70 }

</bundles_post_ra>
